<compile_context>
chip_gen: v5e
topology: v5e:2x2
jax: 0.10.0
libtpu: 0.0.40
codegen_flags: <defaults>
</compile_context>

<pallas_src>
import jax
import jax.numpy as jnp
from jax import lax
from jax.experimental import pallas as pl
from jax.experimental.pallas import tpu as pltpu


def _pick_time_tile(T, halo):
    """Time-tile size: multiples of 16 (bf16 sublane pack) that divide T."""
    if halo > 0:
        # TODO(synk): overlapping-window (halo) time tiling for long sequences.
        return T
    for tt in (512, 256, 128, 64, 32, 16):
        if tt <= T and T % tt == 0:
            return tt
    return T


# ----------------------------------------------------------------------------
# Fused JasperBlock kernel:
#   for r in repeats: mask -> conv (im2col or depthwise+pointwise) -> BN affine
#                     -> (+ residual branch on last repeat) -> ReLU
# ----------------------------------------------------------------------------
def _make_block_kernel(cfg):
    K = cfg['K']
    dil = cfg['dilation']
    pad = (K // 2) * dil
    R = cfg['repeat']
    sep = cfg['separable']
    has_res = cfg['residual']
    res_mode = cfg['residual_mode']
    conv_mask = cfg['conv_mask']
    do_act = cfg['activation']
    T_total = cfg['T_total']

    def kernel(*refs):
        it = iter(refs)
        len_ref = next(it)                       # (B, 1) int32, SMEM
        x_ref = next(it)                         # (tT, Cin) bf16 (batch squeezed)
        rep_refs = []
        for _ in range(R):
            if sep:
                rep_refs.append((next(it), next(it), next(it), next(it)))
            else:
                rep_refs.append((next(it), next(it), next(it)))
        if has_res:
            res_w_ref, res_sc_ref, res_sh_ref = next(it), next(it), next(it)
        o_ref = next(it)                         # (tT, Cout)

        b = pl.program_id(0)
        ti = pl.program_id(1)
        Tt = o_ref.shape[0]

        # global time index of each row of this tile
        t_idx = ti * Tt + lax.broadcasted_iota(jnp.int32, (Tt, 1), 0)

        lm = None
        if conv_mask:
            L = len_ref[b, 0]
            lm = (t_idx < L).astype(jnp.float32)

        def masked(v32):
            return v32 if lm is None else v32 * lm

        def taps(v32):
            """K zero-padded ('same') shifted views of v32 via XLU roll + mask."""
            outs = []
            for k in range(K):
                off = k * dil - pad
                if off == 0:
                    outs.append(v32)
                else:
                    sh = pltpu.roll(v32, shift=(-off) % Tt, axis=0)
                    ok = (t_idx + off >= 0) & (t_idx + off < T_total)
                    outs.append(sh * ok.astype(jnp.float32))
            return outs

        x32 = x_ref[...].astype(jnp.float32)     # (tT, Cin)

        # residual branch: masked 1x1 conv + folded BN on the block input
        res = None
        if has_res:
            res = jnp.dot(masked(x32).astype(jnp.bfloat16), res_w_ref[...],
                          preferred_element_type=jnp.float32)
            res = res * res_sc_ref[...] + res_sh_ref[...]

        v32 = x32
        for r in range(R):
            vm32 = masked(v32)                   # MaskedConv1d input masking
            if sep:
                dw_ref, pw_ref, sc_ref, sh_ref = rep_refs[r]
                dw = dw_ref[...]                 # (K, Cin) f32 depthwise taps
                cols = taps(vm32)
                acc = cols[0] * dw[0:1, :]
                for k in range(1, K):
                    acc = acc + cols[k] * dw[k:k + 1, :]
                acc = masked(acc)                # pointwise MaskedConv1d input mask
                y = jnp.dot(acc.astype(jnp.bfloat16), pw_ref[...],
                            preferred_element_type=jnp.float32)
            else:
                w_ref, sc_ref, sh_ref = rep_refs[r]
                cols = taps(vm32)                # im2col: one wide MXU contraction
                xcat = cols[0] if K == 1 else jnp.concatenate(cols, axis=1)
                y = jnp.dot(xcat.astype(jnp.bfloat16), w_ref[...],
                            preferred_element_type=jnp.float32)
            y = y * sc_ref[...] + sh_ref[...]    # folded BN (or conv bias)
            if r == R - 1 and has_res:
                y = (y + res) if res_mode == 'add' else jnp.maximum(y, res)
            if do_act:
                y = jnp.maximum(y, 0.0)          # ReLU
            v32 = y

        o_ref[...] = v32.astype(o_ref.dtype)

    return kernel


def _full_spec(a):
    nd = a.ndim
    return pl.BlockSpec(a.shape, lambda b, i: (0,) * nd)


def jasper_block(x, len2d, params, lcfg, *, residual_mode='add', conv_mask=True,
                 activation=True, out_dtype=jnp.bfloat16):
    """x: (B, T, Cin) bf16, len2d: (B, 1) int32.  Returns (B, T, Cout)."""
    B, T, Cin = x.shape
    K = lcfg['kernel']
    dil = lcfg.get('dilation', 1)
    R = lcfg['repeat']
    sep = lcfg.get('separable', False)
    has_res = lcfg['residual']
    Cout = lcfg['filters']
    pad = (K // 2) * dil

    tT = _pick_time_tile(T, pad)
    nT = T // tT

    inputs = [len2d, x]
    in_specs = [
        pl.BlockSpec(memory_space=pltpu.MemorySpace.SMEM),           # lengths
        pl.BlockSpec((None, tT, Cin), lambda b, i: (b, i, 0)),       # activations
    ]
    for p in params['subs']:
        tensors = (p['dw'], p['pw'], p['scale'], p['shift']) if sep \
            else (p['w'], p['scale'], p['shift'])
        for a in tensors:
            inputs.append(a)
            in_specs.append(_full_spec(a))
    if has_res:
        for a in (params['res_w'], params['res_scale'], params['res_shift']):
            inputs.append(a)
            in_specs.append(_full_spec(a))

    kernel = _make_block_kernel(dict(
        K=K, dilation=dil, repeat=R, separable=sep, residual=has_res,
        residual_mode=residual_mode, conv_mask=conv_mask, activation=activation,
        T_total=T))

    return pl.pallas_call(
        kernel,
        grid=(B, nT),
        in_specs=in_specs,
        out_specs=pl.BlockSpec((None, tT, Cout), lambda b, i: (b, i, 0)),
        out_shape=jax.ShapeDtypeStruct((B, T, Cout), out_dtype),
        compiler_params=pltpu.CompilerParams(
            dimension_semantics=("parallel", "parallel"),
            vmem_limit_bytes=48 * 1024 * 1024),
    )(*inputs)


# ----------------------------------------------------------------------------
# Parameter init (deterministic, synthetic xavier-uniform; BN at default init)
# ----------------------------------------------------------------------------
def _xavier(key, shape, fan_in, fan_out):
    bound = float((6.0 / (fan_in + fan_out)) ** 0.5)
    return jax.random.uniform(key, shape, jnp.float32, -bound, bound)


def init_params(key, jasper_cfg, feat_in, num_classes):
    eps = 1e-5
    bn_scale = lambda c: jnp.full((1, c), 1.0 / (1.0 + eps) ** 0.5, jnp.float32)
    bn_shift = lambda c: jnp.zeros((1, c), jnp.float32)

    enc = []
    cin = feat_in
    for lcfg in jasper_cfg:
        filters, K, R = lcfg['filters'], lcfg['kernel'], lcfg['repeat']
        separable = lcfg.get('separable', False)
        block = {'subs': []}
        cur = cin
        for _ in range(R):
            p = {}
            if separable:
                key, k1, k2 = jax.random.split(key, 3)
                p['dw'] = _xavier(k1, (K, cur), K, K)                   # torch (cur,1,K), kept f32 (VPU)
                p['pw'] = _xavier(k2, (cur, filters), cur, filters).astype(jnp.bfloat16)
            else:
                key, k1 = jax.random.split(key)
                w = _xavier(k1, (K, cur, filters), cur * K, filters * K)  # torch (filters,cur,K)
                p['w'] = w.reshape(K * cur, filters).astype(jnp.bfloat16)  # im2col layout
            p['scale'] = bn_scale(filters)
            p['shift'] = bn_shift(filters)
            block['subs'].append(p)
            cur = filters
        if lcfg['residual']:
            key, k1 = jax.random.split(key)
            block['res_w'] = _xavier(k1, (cin, filters), cin, filters).astype(jnp.bfloat16)
            block['res_scale'] = bn_scale(filters)
            block['res_shift'] = bn_shift(filters)
        enc.append(block)
        cin = filters

    # decoder: Conv1d(1024, num_classes, k=1, bias=True); pad Cout to 128 lanes
    cpad = max(128, ((num_classes + 127) // 128) * 128)
    key, k1, k2 = jax.random.split(key, 3)
    w = _xavier(k1, (cin, num_classes), cin, num_classes)
    b = jax.random.uniform(k2, (num_classes,), jnp.float32, -0.05, 0.05)
    dec_w = jnp.zeros((cin, cpad), jnp.float32).at[:, :num_classes].set(w)
    dec_w = dec_w.astype(jnp.bfloat16)
    dec_b = jnp.zeros((1, cpad), jnp.float32).at[0, :num_classes].set(b)
    return enc, (dec_w, dec_b, num_classes)


# ----------------------------------------------------------------------------
# Forward pass (mirrors JasperEncoderDecoder.forward)
# ----------------------------------------------------------------------------
def jasper_encoder_decoder_forward(audio_signal, length, enc_params, dec_params,
                                   jasper_cfg, residual_mode='add'):
    # audio_signal: (B, feat_in, T) as in PyTorch NCT
    x = jnp.transpose(audio_signal, (0, 2, 1)).astype(jnp.bfloat16)   # (B, T, C)
    lens = length.astype(jnp.int32)
    len2d = lens.reshape(-1, 1)

    for lcfg, bp in zip(jasper_cfg, enc_params):
        x = jasper_block(x, len2d, bp, lcfg, residual_mode=residual_mode,
                         conv_mask=True, activation=True,
                         out_dtype=jnp.bfloat16)
        # stride == 1 and 'same' padding -> sequence lengths unchanged

    # decoder: Conv1d(1024, num_classes, kernel_size=1, bias=True), no masking.
    dec_w, dec_b, num_classes = dec_params
    cpad = dec_w.shape[-1]
    dec_cfg = dict(filters=cpad, kernel=1, repeat=1, stride=1, dilation=1,
                   residual=False, separable=False)
    dec_bp = {'subs': [{'w': dec_w,
                        'scale': jnp.ones((1, cpad), jnp.float32),
                        'shift': dec_b}]}
    logits = jasper_block(x, len2d, dec_bp, dec_cfg, conv_mask=False,
                          activation=False, out_dtype=jnp.float32)
    logits = logits[:, :, :num_classes]                   # drop lane padding
    return jnp.transpose(logits, (0, 2, 1)), lens         # (B, num_classes, T)


if __name__ == "__main__":
    B, T, FEAT_IN, NUM_CLASSES = 2, 16, 64, 29

    # small QuartzNet-style config: prologue conv, one separable residual block,
    # epilogue 1x1 conv to 1024 channels (decoder expects 1024 in-channels).
    JASPER_CFG = [
        dict(filters=64, repeat=1, kernel=3, stride=1, dilation=1,
             dropout=0.0, residual=False, separable=False),
        dict(filters=64, repeat=2, kernel=3, stride=1, dilation=1,
             dropout=0.0, residual=True, separable=True),
        dict(filters=1024, repeat=1, kernel=1, stride=1, dilation=1,
             dropout=0.0, residual=False, separable=False),
    ]

    key = jax.random.PRNGKey(0)
    k_x, k_p = jax.random.split(key)
    audio_signal = jax.random.normal(k_x, (B, FEAT_IN, T), jnp.float32)  # NCT
    length = jnp.array([16, 11], dtype=jnp.int32)

    enc_params, dec_params = init_params(k_p, JASPER_CFG, FEAT_IN, NUM_CLASSES)

    logits, out_len = jasper_encoder_decoder_forward(
        audio_signal, length, enc_params, dec_params, JASPER_CFG)
    jax.block_until_ready(logits)

    assert logits.shape == (B, NUM_CLASSES, T), logits.shape
    assert out_len.shape == (B,)
    assert bool(jnp.all(jnp.isfinite(logits)))
    print("KERNEL_OK")
</pallas_src>

<mosaic_0001>
module attributes {stable_mosaic.version = 11 : i64} {
  func.func @kernel(%arg0: i32, %arg1: i32, %arg2: memref<2x1xi32, #tpu.memory_space<smem>>, %arg3: memref<1x16x64xbf16, #tpu.memory_space<vmem>>, %arg4: memref<192x64xbf16, #tpu.memory_space<vmem>>, %arg5: memref<1x64xf32, #tpu.memory_space<vmem>>, %arg6: memref<1x64xf32, #tpu.memory_space<vmem>>, %arg7: memref<1x16x64xbf16, #tpu.memory_space<vmem>>) attributes {dimension_semantics = [#tpu.dimension_semantics<parallel>, #tpu.dimension_semantics<parallel>], iteration_bounds = array<i64: 2, 1>, scalar_prefetch = 0 : i64, scratch_operands = 0 : i64, tpu.core_type = #tpu.core_type<tc>, window_params = [{transform_indices = @transform_0, window_bounds = array<i64: 2, 1>}, {transform_indices = @transform_1, window_bounds = array<i64: 1, 16, 64>}, {pipeline_mode = #tpu.pipeline_mode<synchronous>, transform_indices = @transform_2, window_bounds = array<i64: 192, 64>}, {pipeline_mode = #tpu.pipeline_mode<synchronous>, transform_indices = @transform_3, window_bounds = array<i64: 1, 64>}, {pipeline_mode = #tpu.pipeline_mode<synchronous>, transform_indices = @transform_4, window_bounds = array<i64: 1, 64>}, {transform_indices = @transform_5, window_bounds = array<i64: 1, 16, 64>}]} {
    %c16_i32 = arith.constant 16 : i32
    %0 = arith.muli %arg1, %c16_i32 : i32
    %1 = tpu.iota {dimensions = array<i32: 0>} : vector<16x1xi32>
    %2 = vector.broadcast %0 : i32 to vector<16x1xi32>
    %3 = arith.addi %2, %1 : vector<16x1xi32>
    %4 = arith.index_cast %arg0 : i32 to index
    %c0 = arith.constant 0 : index
    %5 = memref.load %arg2[%4, %c0] : memref<2x1xi32, #tpu.memory_space<smem>>
    %6 = vector.broadcast %5 : i32 to vector<16x1xi32>
    %7 = arith.cmpi slt, %3, %6 : vector<16x1xi32>
    %8 = arith.extui %7 : vector<16x1xi1> to vector<16x1xi32>
    %9 = arith.sitofp %8 : vector<16x1xi32> to vector<16x1xf32>
    %c0_0 = arith.constant 0 : index
    %c0_1 = arith.constant 0 : index
    %c0_2 = arith.constant 0 : index
    %10 = vector.load %arg3[%c0_0, %c0_1, %c0_2] : memref<1x16x64xbf16, #tpu.memory_space<vmem>>, vector<1x16x64xbf16>
    %11 = vector.shape_cast %10 : vector<1x16x64xbf16> to vector<16x64xbf16>
    %12 = arith.extf %11 : vector<16x64xbf16> to vector<16x64xf32>
    %13 = vector.broadcast %9 : vector<16x1xf32> to vector<16x64xf32>
    %14 = arith.mulf %12, %13 : vector<16x64xf32>
    %c1_i32 = arith.constant 1 : i32
    %15 = tpu.dynamic_rotate %14 by %c1_i32 dim 0 : vector<16x64xf32>, i32 -> vector<16x64xf32>
    %c-1_i32 = arith.constant -1 : i32
    %16 = vector.broadcast %c-1_i32 : i32 to vector<16x1xi32>
    %17 = arith.addi %3, %16 : vector<16x1xi32>
    %c0_i32 = arith.constant 0 : i32
    %18 = vector.broadcast %c0_i32 : i32 to vector<16x1xi32>
    %19 = arith.cmpi sge, %17, %18 : vector<16x1xi32>
    %c-1_i32_3 = arith.constant -1 : i32
    %20 = vector.broadcast %c-1_i32_3 : i32 to vector<16x1xi32>
    %21 = arith.addi %3, %20 : vector<16x1xi32>
    %c16_i32_4 = arith.constant 16 : i32
    %22 = vector.broadcast %c16_i32_4 : i32 to vector<16x1xi32>
    %23 = arith.cmpi slt, %21, %22 : vector<16x1xi32>
    %24 = arith.andi %19, %23 : vector<16x1xi1>
    %25 = arith.extui %24 : vector<16x1xi1> to vector<16x1xi32>
    %26 = arith.sitofp %25 : vector<16x1xi32> to vector<16x1xf32>
    %27 = vector.broadcast %26 : vector<16x1xf32> to vector<16x64xf32>
    %28 = arith.mulf %15, %27 : vector<16x64xf32>
    %c15_i32 = arith.constant 15 : i32
    %29 = tpu.dynamic_rotate %14 by %c15_i32 dim 0 : vector<16x64xf32>, i32 -> vector<16x64xf32>
    %c1_i32_5 = arith.constant 1 : i32
    %30 = vector.broadcast %c1_i32_5 : i32 to vector<16x1xi32>
    %31 = arith.addi %3, %30 : vector<16x1xi32>
    %c0_i32_6 = arith.constant 0 : i32
    %32 = vector.broadcast %c0_i32_6 : i32 to vector<16x1xi32>
    %33 = arith.cmpi sge, %31, %32 : vector<16x1xi32>
    %c1_i32_7 = arith.constant 1 : i32
    %34 = vector.broadcast %c1_i32_7 : i32 to vector<16x1xi32>
    %35 = arith.addi %3, %34 : vector<16x1xi32>
    %c16_i32_8 = arith.constant 16 : i32
    %36 = vector.broadcast %c16_i32_8 : i32 to vector<16x1xi32>
    %37 = arith.cmpi slt, %35, %36 : vector<16x1xi32>
    %38 = arith.andi %33, %37 : vector<16x1xi1>
    %39 = arith.extui %38 : vector<16x1xi1> to vector<16x1xi32>
    %40 = arith.sitofp %39 : vector<16x1xi32> to vector<16x1xf32>
    %41 = vector.broadcast %40 : vector<16x1xf32> to vector<16x64xf32>
    %42 = arith.mulf %29, %41 : vector<16x64xf32>
    %43 = tpu.concatenate %28, %14, %42 in 1 : vector<16x64xf32>, vector<16x64xf32>, vector<16x64xf32> -> vector<16x192xf32>
    %44 = arith.truncf %43 : vector<16x192xf32> to vector<16x192xbf16>
    %c0_9 = arith.constant 0 : index
    %c0_10 = arith.constant 0 : index
    %45 = vector.load %arg4[%c0_9, %c0_10] : memref<192x64xbf16, #tpu.memory_space<vmem>>, vector<192x64xbf16>
    %cst = arith.constant dense<0.000000e+00> : vector<16x64xf32>
    %46 = tpu.matmul %44, %45, %cst {dimension_numbers = #tpu.dot_dimension_numbers<[1], [0], [0], [1], [0, 0, 1, 1], [], []>} : vector<16x192xbf16>, vector<192x64xbf16>, vector<16x64xf32> -> vector<16x64xf32>
    %c0_11 = arith.constant 0 : index
    %c0_12 = arith.constant 0 : index
    %47 = vector.load %arg5[%c0_11, %c0_12] : memref<1x64xf32, #tpu.memory_space<vmem>>, vector<1x64xf32>
    %48 = vector.broadcast %47 : vector<1x64xf32> to vector<16x64xf32>
    %49 = arith.mulf %46, %48 : vector<16x64xf32>
    %c0_13 = arith.constant 0 : index
    %c0_14 = arith.constant 0 : index
    %50 = vector.load %arg6[%c0_13, %c0_14] : memref<1x64xf32, #tpu.memory_space<vmem>>, vector<1x64xf32>
    %51 = vector.broadcast %50 : vector<1x64xf32> to vector<16x64xf32>
    %52 = arith.addf %49, %51 : vector<16x64xf32>
    %cst_15 = arith.constant 0.000000e+00 : f32
    %53 = vector.broadcast %cst_15 : f32 to vector<16x64xf32>
    %54 = arith.maximumf %52, %53 : vector<16x64xf32>
    %55 = arith.truncf %54 : vector<16x64xf32> to vector<16x64xbf16>
    %c0_16 = arith.constant 0 : index
    %c0_17 = arith.constant 0 : index
    %c0_18 = arith.constant 0 : index
    %56 = vector.load %arg7[%c0_16, %c0_17, %c0_18] : memref<1x16x64xbf16, #tpu.memory_space<vmem>>, vector<1x16x64xbf16>
    %57 = vector.shape_cast %56 : vector<1x16x64xbf16> to vector<16x64xbf16>
    %58 = vector.shape_cast %55 : vector<16x64xbf16> to vector<1x16x64xbf16>
    tpu.vector_store %arg7[%c0_16, %c0_17, %c0_18], %58 {strides = array<i32>} : memref<1x16x64xbf16, #tpu.memory_space<vmem>>, vector<1x16x64xbf16>,
    return
  }
  func.func @transform_0(%arg0: i32, %arg1: i32) -> (i32, i32) {
    %c0_i32 = arith.constant 0 : i32
    %c0_i32_0 = arith.constant 0 : i32
    %c0_i32_1 = arith.constant 0 : i32
    return %c0_i32, %c0_i32_0 : i32, i32
  }
  func.func @transform_1(%arg0: i32, %arg1: i32) -> (i32, i32, i32) {
    %c0_i32 = arith.constant 0 : i32
    %c0_i32_0 = arith.constant 0 : i32
    return %arg0, %arg1, %c0_i32 : i32, i32, i32
  }
  func.func @transform_2(%arg0: i32, %arg1: i32) -> (i32, i32) {
    %c0_i32 = arith.constant 0 : i32
    %c0_i32_0 = arith.constant 0 : i32
    %c0_i32_1 = arith.constant 0 : i32
    return %c0_i32, %c0_i32_0 : i32, i32
  }
  func.func @transform_3(%arg0: i32, %arg1: i32) -> (i32, i32) {
    %c0_i32 = arith.constant 0 : i32
    %c0_i32_0 = arith.constant 0 : i32
    %c0_i32_1 = arith.constant 0 : i32
    return %c0_i32, %c0_i32_0 : i32, i32
  }
  func.func @transform_4(%arg0: i32, %arg1: i32) -> (i32, i32) {
    %c0_i32 = arith.constant 0 : i32
    %c0_i32_0 = arith.constant 0 : i32
    %c0_i32_1 = arith.constant 0 : i32
    return %c0_i32, %c0_i32_0 : i32, i32
  }
  func.func @transform_5(%arg0: i32, %arg1: i32) -> (i32, i32, i32) {
    %c0_i32 = arith.constant 0 : i32
    %c0_i32_0 = arith.constant 0 : i32
    return %arg0, %arg1, %c0_i32 : i32, i32, i32
  }
}

</mosaic_0001>

<bundles_post_ra>
// kernel: tpu_custom_call.1
= control target key start
LH: loop header
LB: loop body
LE: loop exit
PB: predicated region body
PF: predicated region fallthrough
CT: control target
= control target key end

     0   :  { %10 = vsyncpa [#allocation4], 0  ;;  %s1051_s0 = inlined_call_operand.vmem [shape: s32[2,1], index: 0, kind: input, shape index: {}]   ;;  %s1052_s1 = inlined_call_operand.vmem [shape: bf16[2,16,64], index: 1, kind: input, shape index: {}]   ;;  %s1053_s2 = inlined_call_operand.vmem [shape: bf16[192,64], index: 2, kind: input, shape index: {}]   ;;  %s1054_s3 = inlined_call_operand.vmem [shape: f32[1,64], index: 3, kind: input, shape index: {}]   ;;  %s1055_s4 = inlined_call_operand.vmem [shape: f32[1,64], index: 4, kind: input, shape index: {}]   ;;  %s1056_s5 = inlined_call_operand.hbm [shape: bf16[2,16,64], index: 5, kind: output, shape index: {}]  }
   0x1   :  { %11 = vsyncpa [#allocation3], 0 }
   0x2   :  { %13 = vsyncpa [#allocation3 + $0x1], 0  ;;  %s893_s18 = smov 0   ;;  %s895_s19 = smov 0  }
   0x3   :  { %s897_s20 = smov 0   ;;  %s899_s21 = smov 0  }
   0x4   :  { %s901_s22 = smov 0   ;;  %s903_s23 = smov 0  }
   0x5 LB: > { %s597_s24 = sadd.s32 4294967295, %s857_s23   ;;  %s598_s25 = sadd.s32 4294967294, %s857_s23   ;;  %s857_s23 = sphi %s903_s23, %s19_s23   ;;  %s853_s22 = sphi %s901_s22, %s1063_s22   ;;  %s849_s21 = sphi %s899_s21, %s1062_s21   ;;  %s845_s20 = sphi %s897_s20, %s1061_s20   ;;  %s841_s19 = sphi %s895_s19, %s1060_s19   ;;  %s837_s18 = sphi %s893_s18, %s1059_s18  }
   0x6   : > { %s31_s26 = sadd.s32 1, %s853_s22  ;;  %s152_s27 = sadd.s32 1, %s845_s20 }
   0x7   : > { %p33_p0 = scmp.ge.s32.totalorder %s31_s26, 2  ;;  %p162_p1 = scmp.ne.s32.totalorder %s845_s20, %s841_s19 }
   0x8   : > { %p163_p2 = scmp.eq.s32.totalorder %s597_s24, 1  ;;  %p168_p3 = scmp.ne.s32.totalorder %s841_s19, %s837_s18 }
   0x9   : > { %s1065_s26 = smov (%p33_p0, %s31_s26), 0  ;;  %p169_p5 = scmp.eq.s32.totalorder %s598_s25, 1 }
   0xa   : > { %p933_p4 = por %p163_p2, %p162_p1  ;;  %s147_s29 = ssub.s32 %s853_s22, %s1065_s26 }
   0xb   : > { %p599_p6 = scmp.ge.s32.totalorder %s857_s23, 1  ;;  %p150_p7 = scmp.eq.s32.totalorder %s147_s29, 0 }
   0xc   : > { %p940_p8 = por %p169_p5, %p168_p3  ;;  %p176_p9 = scmp.lt.s32.totalorder %s857_s23, 3 }
   0xd   : > { %s946_s6 = scalar_select %p150_p7, %s845_s20, %s152_s27  }
   0xe   : > { %p177_p10 = pnand %p599_p6, %p176_p9  ;;  %p698_p11 = scmp.eq.s32.totalorder %s597_s24, 0 }
   0xf   : > { %s188_s9 = sshll.u32 %s1051_s0, 4  ;;  %s859_s10 = smov [#allocation2]   ;;  %s189_s9 = int_to_ptr.vmem [resolvable:$true] %s188_s9 }
  0x10   : > { %p690_p12 = pneg %p177_p10  ;;  %223 = sbr.rel (%p177_p10) target bundleno = 306 (0x132), region = 40 }
  0x12   : > { %p691_p13 = pnand %p698_p11, %p690_p12 }
  0x14   : > { %693 = dma.vmem_to_smem (!%p691_p13), %s189_s9, 32, %s859_s10, [#allocation4]  }
  0x15   : > { %828 = dma.done.wait (%p698_p11), [#allocation4], 32  }
  0x16   : > { %830 = vsyncadd (%p698_p11), [#allocation4], 4294967264 }
  0x17   : > { %230 = sfence }
  0x18   : > { %p258_p0 = scmp.lt.s32.totalorder %s849_s21, 1  ;;  %v270_v0 = vlaneseq  ;;  %s607_s11 = sshll.u32 %s849_s21, 7  ;;  %v674_v1 = vld [vmem:[%s1053_s2 + $0x38] sm:$0xff]  ;;  %v673_v4 = vld [vmem:[%s1053_s2 + $0x30] sm:$0xff]  ;;  %v672_v8 = vld [vmem:[%s1053_s2 + $0x28] sm:$0xff]  ;;  %v860_v14 = vmov 0.0  }
  0x19   : > { %s277_s14 = sld [smem:[#allocation2 + %s607_s11]]  ;;  %v678_v2 = vld [vmem:[%s1053_s2 + $0x58] sm:$0xff]  ;;  %441 = vmatpush.bf16.msra.mxu0 %v674_v1  ;;  %v677_v5 = vld [vmem:[%s1053_s2 + $0x50] sm:$0xff]  ;;  %v676_v13 = vld [vmem:[%s1053_s2 + $0x48] sm:$0xff]  ;;  %s861_s25 = smov 64   ;;  %vm337_vm4 = vcmask 523264  }
  0x1a   : > { %s259_s17 = scalar_select %p258_p0, %s849_s21, 1  ;;  %v960_v3 = vshrl.u32 %v270_v0, 7  ;;  %459 = vmatpush.bf16.msra.mxu1 %v678_v2  ;;  %v671_v19 = vld [vmem:[%s1053_s2 + $0x20] sm:$0xff]  ;;  %v670_v25 = vld [vmem:[%s1053_s2 + $0x18] sm:$0xff]  ;;  %v669_v30 = vld [vmem:[%s1053_s2 + $0x10] sm:$0xff]  ;;  %vm485_vm7 = vcmask 519168  }
  0x1b   : > { %v675_v20 = vld [vmem:[%s1053_s2 + $0x40] sm:$0xff]  ;;  %v668_v31 = vld [vmem:[%s1053_s2 + $0x8] sm:$0xff]  ;;  %s679_s27 = sshll.u32 %s849_s21, 3 }
  0x1c   : > { %s666_s7 = sshll.u32 %s259_s17, 3  ;;  %v272_v6 = vadd.s32 8, %v960_v3  ;;  %vm312_vm3 = vcmp.lt.s32.totalorder %v960_v3, 7  ;;  %v667_v32 = vld [vmem:[%s1053_s2] sm:$0xff]  ;;  %v296_v33 = vadd.s32 4294967295, %v960_v3  ;;  %vm293_vm5 = vcmp.lt.s32.totalorder %v960_v3, 1  ;;  %s502_s9 = scalar_lea.hbm %s1056_s5, %s679_s27 }
  0x1d   : > { %s265_s10 = scalar_lea.vmem %s1052_s1, %s666_s7  ;;  %442 = vmatpush.bf16.msra.mxu0 %v673_v4  ;;  %v758_v47 = vld [vmem:[%s1054_s3] ss:$0 sm:$0xff]  ;;  %s505_s11 = sshll.u32 %s502_s9, 4  ;;  %s506_s11 = int_to_ptr.hbm [resolvable:$true] %s505_s11 }
  0x1e   : > { %v681_v7 = vld [vmem:[%s265_s10] sm:$0xff]   ;;  %v316_v9 = vadd.s32 1, %v272_v6  ;;  %460 = vmatpush.bf16.msra.mxu1 %v677_v5  ;;  %vm298_vm6 = vcmp.ge.s32.totalorder %v296_v33, 0  ;;  %s789_s12 = sshra.s32 %s506_s11, 4  ;;  %s795_s17 = scalar_lea.hbm %s1056_s5, 16  ;;  %s790_s12 = int_to_ptr.hbm [resolvable:$true] %s789_s12 }
  0x1f   : > { %v278_v10 = vstv %s277_s14  ;;  %v682_v11 = vunpack.c.l.bf16 %v681_v7  ;;  %v683_v12 = vunpack.c.h.bf16 %v681_v7  ;;  %v610_v37 = vsel %vm298_vm6, 1.0, %v860_v14  ;;  %v759_v50 = vld [vmem:[%s1055_s4] ss:$0 sm:$0xff]  ;;  %s254_s14 = sand.u32 1, %s841_s19   ;;  %s791_s13 = scalar_lea.hbm %s790_s12, 8 }
  0x20   : > { %vm279_vm0 = vcmp.lt.s32.totalorder %v960_v3, %v278_v10  ;;  %vm280_vm1 = vcmp.lt.s32.totalorder %v272_v6, %v278_v10  ;;  %vm320_vm2 = vcmp.lt.s32.totalorder %v316_v9, 16  ;;  %s604_s24 = sshll.u32 %s254_s14, 3  ;;  %s489_s21 = scalar_lea.sflag [#allocation3], %s254_s14 }
  0x21   : > { %v608_v15 = vsel %vm279_vm0, 1.0, %v860_v14  ;;  %v609_v16 = vsel %vm280_vm1, 1.0, %v860_v14  ;;  %443 = vmatpush.bf16.msra.mxu0 %v672_v8  ;;  %v611_v24 = vsel %vm320_vm2, 1.0, %v860_v14  ;;  %s256_s29 = scalar_lea.vmem [#allocation5], %s604_s24  ;;  %p792_p1 = scmp.ne.s32.totalorder %s790_s12, %s791_s13 }
  0x22   : > { %v289_v17 = vmul.f32 %v682_v11, %v608_v15  ;;  %v290_v18 = vmul.f32 %v683_v12, %v609_v16  ;;  %461 = vmatpush.bf16.msra.mxu1 %v676_v13  ;;  %s503_s10 = sshll.u32 %s256_s29, 4  ;;  %p796_p5 = scmp.lt.s32.totalorder %s790_s12, %s1056_s5  ;;  %s504_s10 = int_to_ptr.vmem [resolvable:$true] %s503_s10 }
  0x23   : > { %p793_p2 = pnand %p792_p1, %p933_p4  ;;  %p797_p6 = scmp.lt.s32.totalorder %s795_s17, %s791_s13 }
  0x24   : > { %v753_v21 = vpack.i.bf16 %v290_v18, %v289_v17  ;;  %v310_v22 = vrot.slane %v289_v17, 1  ;;  %v311_v23 = vrot.slane %v290_v18, 1  ;;  %v291_v34 = vrot.slane %v289_v17, 7 }
  0x25   : > { %444 = vmatpush.bf16.msra.mxu0 %v671_v19  ;;  %v292_v35 = vrot.slane %v290_v18, 7  ;;  %p794_p3 = pneg %p793_p2  ;;  %p798_p7 = por %p797_p6, %p796_p5 }
  0x26   : > { %754 = vrot.lane.b32.xlu0 %v753_v21, %s861_s25  ;;  %v313_v26 = vsel %vm312_vm3, %v310_v22, %v311_v23  ;;  %v314_v27 = vsel %vm312_vm3, %v311_v23, %v310_v22  ;;  %462 = vmatpush.bf16.msra.mxu1 %v675_v20 }
  0x27   : > { %v328_v28 = vmul.f32 %v611_v24, %v314_v27  ;;  %v295_v36 = vsel %vm293_vm5, %v292_v35, %v291_v34  ;;  %v294_v40 = vsel %vm293_vm5, %v291_v34, %v292_v35  ;;  %p799_p9 = pnand %p798_p7, %p794_p3 }
  0x28   : > { %v308_v38 = vmul.f32 %v610_v37, %v295_v36 }
  0x29   : > { %v341_v29 = vpack.c.bf16 %v328_v28, %v313_v26  ;;  %445 = vmatpush.bf16.msra.mxu0 %v670_v25 }
  0x2b   : > { %660 = vmatmul.msk.bf16.vlgmr.msra.gmra.mxu1 %vm337_vm4, %v341_v29 }
  0x2d   : > { %446 = vmatpush.bf16.msra.mxu0 %v669_v30 }
  0x31   : > { %447 = vmatpush.bf16.msra.mxu0 %v668_v31 }
  0x35   : > { %448 = vmatpush.bf16.msra.mxu0 %v667_v32 }
  0x98   : > { %v755_v39 = vpop.permute.xlu0 %754 }
  0x99   : > { %v757_v41 = vunpack.i.h.bf16 %v755_v39  ;;  %v756_v42 = vunpack.i.l.bf16 %v755_v39 }
  0x9b   : > { %v338_v43 = vsel %vm337_vm4, %v308_v38, %v756_v42  ;;  %v339_v44 = vsel %vm337_vm4, %v294_v40, %v757_v41 }
  0x9c   : > { %v340_v45 = vpack.c.bf16 %v339_v44, %v338_v43 }
  0x9e   : > { %449 = vmatmul.bf16.vlgmr.msra.gmra.mxu0 %v340_v45 }
  0xa8   : > { %v464_v46 = vpop.f32.mrf.mxu1 }
  0xb0   : > { %v466_v54 = vpop.f32.mrf.mxu1 }
 0x11b   : > { %v450_v48 = vpop.f32.mrf.mxu0 }
 0x11c   : > { %v465_v49 = vadd.f32 %v464_v46, %v450_v48 }
 0x11e   : > { %v473_v51 = vmul.f32 %v758_v47, %v465_v49 }
 0x120   : > { %v479_v52 = vadd.f32 %v759_v50, %v473_v51 }
 0x122   : > { %v481_v53 = vmax.f32 %v479_v52, 0.0 }
 0x123   : > { %v452_v55 = vpop.f32.mrf.mxu0 }
 0x124   : > { %v483_v56 = vpack.c.bf16 %v481_v53, %v481_v53  ;;  %v467_v57 = vadd.f32 %v466_v54, %v452_v55 }
 0x126   : > { %486 = vst.msk [vmem:[%s256_s29] sm:$0xf] %vm485_vm7, %v483_v56  ;;  %v474_v58 = vmul.f32 %v758_v47, %v467_v57 }
 0x128   : > { %v480_v59 = vadd.f32 %v759_v50, %v474_v58 }
 0x12a   : > { %v482_v60 = vmax.f32 %v480_v59, 0.0 }
 0x12c   : > { %v484_v61 = vpack.c.bf16 %v482_v60, %v482_v60 }
 0x12e   : > { %487 = vst.msk [vmem:[%s256_s29 + $0x4] sm:$0xf] %vm485_vm7, %v484_v61 }
 0x12f   : > { %802 = shalt.err (!%p799_p9)
}
 0x130   : > { %s862_s14 = smov 4  }
 0x131   : > { %688 = dma.vmem_to_hbm [thread:$0]  (%p933_p4), %s504_s10, 128, %s506_s11, %s489_s21, %s861_s25, %s861_s25, %s862_s14  }
 0x132 PF: > { %p700_p10 = scmp.ge.s32.totalorder %s857_s23, 2  ;;  %s520_s29 = sand.u32 1, %s837_s18  }
 0x133   : > { %s521_s7 = scalar_lea.sflag [#allocation3], %s520_s29 }
 0x134   : > { %p695_p11 = pnand %p700_p10, %p940_p8 }
 0x136   : > { %p696_p12 = pneg %p695_p11 }
 0x138   : > { %832 = dma.done.wait (%p696_p12), %s521_s7, 128  }
 0x139   : > { %834 = vsyncadd (%p696_p12), %s521_s7, 4294967168  ;;  %s19_s23 = sadd.s32 1, %s857_s23   ;;  %s1059_s18 = smov %s841_s19 }
 0x13a   : > { %p16_p13 = scmp.ge.s32.totalorder %s19_s23, 4   ;;  %s1060_s19 = smov %s845_s20 }
 0x13b   : > { %s1061_s20 = smov %s946_s6  ;;  %s1062_s21 = smov %s853_s22 }
 0x13c   : > { %s1063_s22 = smov %s1065_s26  ;;  %18 = sbr.rel (!%p16_p13) target bundleno = 5 (0x5), region = 80 }
 0x141   :  { %527 = vsyncpa [#allocation3], 1 }
 0x142   :  { %529 = vsyncpa [#allocation3 + $0x1], 1 }
 0x143   :  { %530 = vsyncpa [#allocation4], 1 }
 0x144   :  { %532 = vsyncpa [#allocation4 + $0x1], 1 }

</bundles_post_ra>
